<compile_context>
chip_gen: v5e
topology: v5e:2x2
jax: 0.10.0
libtpu: 0.0.40
codegen_flags: <defaults>
</compile_context>

<pallas_src>
import functools

import jax
import jax.numpy as jnp
from jax.experimental import pallas as pl
from jax.experimental.pallas import tpu as pltpu


def _round_up(n, m):
    return ((n + m - 1) // m) * m


def mlp_kernel(x_ref, w1_ref, b1_ref, w2_ref, b2_ref, o_ref):
    # fc1: (TB, D) @ (D, H) on the MXU in bf16, f32 accumulate.
    h = jnp.dot(x_ref[...], w1_ref[...], preferred_element_type=jnp.float32)
    h = h + b1_ref[...]                       # f32 bias add (VPU)
    # Sigmoid: exp goes to the EUP; approx reciprocal also uses the EUP slot
    # instead of the long-latency f32 divide.
    h = pl.reciprocal(1.0 + jnp.exp(-h), approx=True)
    # fc2: (TB, H) @ (H, C_pad) in bf16, f32 accumulate. C_pad is lane-dense.
    out = jnp.dot(h.astype(w2_ref.dtype), w2_ref[...],
                  preferred_element_type=jnp.float32)
    o_ref[...] = (out + b2_ref[...]).astype(o_ref.dtype)


@functools.partial(jax.jit, static_argnames=("tile_b",))
def neural_net_forward(x, w1, b1, w2, b2, *, tile_b=None):
    """x: (B, D); w1: (D, H); b1: (1, H) or (H,); w2: (H, C); b2: (1, C) or (C,)."""
    B, D = x.shape
    H, C = w2.shape

    # Lane-dense output: pad class dim to a multiple of 128.
    C_pad = _round_up(max(C, 128), 128)
    # Batch tiling: big tiles when B is large, single tile otherwise.
    if tile_b is None:
        tile_b = min(512, _round_up(B, 8))
    B_pad = _round_up(B, tile_b)

    # Wrapper-side padding / dtype casts (bf16 matmul inputs, f32 biases).
    x_p = jnp.pad(x, ((0, B_pad - B), (0, 0))).astype(jnp.bfloat16)
    w1_b = w1.astype(jnp.bfloat16)
    b1_p = jnp.reshape(b1, (1, H)).astype(jnp.float32)
    w2_p = jnp.pad(w2, ((0, 0), (0, C_pad - C))).astype(jnp.bfloat16)
    b2_p = jnp.pad(jnp.reshape(b2, (1, C)), ((0, 0), (0, C_pad - C))).astype(jnp.float32)

    grid = (B_pad // tile_b,)
    out = pl.pallas_call(
        mlp_kernel,
        out_shape=jax.ShapeDtypeStruct((B_pad, C_pad), jnp.float32),
        grid_spec=pltpu.PrefetchScalarGridSpec(
            num_scalar_prefetch=0,
            grid=grid,
            in_specs=[
                pl.BlockSpec((tile_b, D), lambda i: (i, 0)),   # x tile, pipelined over batch
                pl.BlockSpec((D, H),      lambda i: (0, 0)),   # w1 resident in VMEM
                pl.BlockSpec((1, H),      lambda i: (0, 0)),   # b1 resident
                pl.BlockSpec((H, C_pad),  lambda i: (0, 0)),   # w2 resident
                pl.BlockSpec((1, C_pad),  lambda i: (0, 0)),   # b2 resident
            ],
            out_specs=pl.BlockSpec((tile_b, C_pad), lambda i: (i, 0)),
        ),
        compiler_params=pltpu.CompilerParams(
            # Batch axis is independent -> shard across v7x's two TensorCores.
            dimension_semantics=("parallel",),
        ),
    )(x_p, w1_b, b1_p, w2_p, b2_p)

    return out[:B, :C]


def init_params(key, input_size, hidden_size, num_classes):
    # Deterministic init mimicking nn.Linear's uniform(-1/sqrt(fan_in), 1/sqrt(fan_in)).
    k1, k2, k3, k4 = jax.random.split(key, 4)
    bound1 = 1.0 / jnp.sqrt(input_size)
    bound2 = 1.0 / jnp.sqrt(hidden_size)
    w1 = jax.random.uniform(k1, (input_size, hidden_size), jnp.float32, -bound1, bound1)
    b1 = jax.random.uniform(k2, (1, hidden_size), jnp.float32, -bound1, bound1)
    w2 = jax.random.uniform(k3, (hidden_size, num_classes), jnp.float32, -bound2, bound2)
    b2 = jax.random.uniform(k4, (1, num_classes), jnp.float32, -bound2, bound2)
    return w1, b1, w2, b2


if __name__ == "__main__":
    batch = 8
    input_size = 16
    hidden_size = 32
    num_classes = 8

    key = jax.random.PRNGKey(0)
    kx, kp = jax.random.split(key)
    x = jax.random.normal(kx, (batch, input_size), jnp.float32)
    w1, b1, w2, b2 = init_params(kp, input_size, hidden_size, num_classes)

    out = neural_net_forward(x, w1, b1, w2, b2)
    jax.block_until_ready(out)

    # Reference in plain JAX, mirroring the kernel's bf16 matmul inputs
    # (f32 accumulation on the MXU).
    xb = x.astype(jnp.bfloat16).astype(jnp.float32)
    w1b = w1.astype(jnp.bfloat16).astype(jnp.float32)
    w2b = w2.astype(jnp.bfloat16).astype(jnp.float32)
    h_ref = jax.nn.sigmoid(xb @ w1b + b1)
    ref = h_ref.astype(jnp.bfloat16).astype(jnp.float32) @ w2b + b2

    assert out.shape == (batch, num_classes)
    # Tolerance covers bf16 rounding + approx-reciprocal sigmoid.
    assert jnp.allclose(out, ref, atol=1e-2, rtol=1e-2), (
        f"max abs err {jnp.max(jnp.abs(out - ref))}")

    print("KERNEL_OK")
</pallas_src>

<mosaic_0001>
module attributes {stable_mosaic.version = 11 : i64} {
  func.func @mlp_kernel(%arg0: i32, %arg1: memref<8x16xbf16, #tpu.memory_space<vmem>>, %arg2: memref<16x32xbf16, #tpu.memory_space<vmem>>, %arg3: memref<1x32xf32, #tpu.memory_space<vmem>>, %arg4: memref<32x128xbf16, #tpu.memory_space<vmem>>, %arg5: memref<1x128xf32, #tpu.memory_space<vmem>>, %arg6: memref<8x128xf32, #tpu.memory_space<vmem>>) attributes {dimension_semantics = [#tpu.dimension_semantics<parallel>], iteration_bounds = array<i64: 1>, scalar_prefetch = 0 : i64, scratch_operands = 0 : i64, tpu.core_type = #tpu.core_type<tc>, window_params = [{transform_indices = @transform_0, window_bounds = array<i64: 8, 16>}, {pipeline_mode = #tpu.pipeline_mode<synchronous>, transform_indices = @transform_1, window_bounds = array<i64: 16, 32>}, {pipeline_mode = #tpu.pipeline_mode<synchronous>, transform_indices = @transform_2, window_bounds = array<i64: 1, 32>}, {pipeline_mode = #tpu.pipeline_mode<synchronous>, transform_indices = @transform_3, window_bounds = array<i64: 32, 128>}, {pipeline_mode = #tpu.pipeline_mode<synchronous>, transform_indices = @transform_4, window_bounds = array<i64: 1, 128>}, {transform_indices = @transform_5, window_bounds = array<i64: 8, 128>}]} {
    %c0 = arith.constant 0 : index
    %c0_0 = arith.constant 0 : index
    %0 = vector.load %arg1[%c0, %c0_0] : memref<8x16xbf16, #tpu.memory_space<vmem>>, vector<8x16xbf16>
    %c0_1 = arith.constant 0 : index
    %c0_2 = arith.constant 0 : index
    %1 = vector.load %arg2[%c0_1, %c0_2] : memref<16x32xbf16, #tpu.memory_space<vmem>>, vector<16x32xbf16>
    %cst = arith.constant dense<0.000000e+00> : vector<8x32xf32>
    %2 = tpu.matmul %0, %1, %cst {dimension_numbers = #tpu.dot_dimension_numbers<[1], [0], [0], [1], [0, 0, 1, 1], [], []>} : vector<8x16xbf16>, vector<16x32xbf16>, vector<8x32xf32> -> vector<8x32xf32>
    %c0_3 = arith.constant 0 : index
    %c0_4 = arith.constant 0 : index
    %3 = vector.load %arg3[%c0_3, %c0_4] : memref<1x32xf32, #tpu.memory_space<vmem>>, vector<1x32xf32>
    %4 = vector.broadcast %3 : vector<1x32xf32> to vector<8x32xf32>
    %5 = arith.addf %2, %4 : vector<8x32xf32>
    %cst_5 = arith.constant 0.000000e+00 : f32
    %6 = vector.broadcast %cst_5 : f32 to vector<8x32xf32>
    %7 = arith.subf %6, %5 : vector<8x32xf32>
    %8 = math.exp %7 : vector<8x32xf32>
    %cst_6 = arith.constant 1.000000e+00 : f32
    %9 = vector.broadcast %cst_6 : f32 to vector<8x32xf32>
    %10 = arith.addf %9, %8 : vector<8x32xf32>
    %11 = tpu.reciprocal %10 {approx = true} : vector<8x32xf32> -> vector<8x32xf32>
    %12 = arith.truncf %11 : vector<8x32xf32> to vector<8x32xbf16>
    %c0_7 = arith.constant 0 : index
    %c0_8 = arith.constant 0 : index
    %13 = vector.load %arg4[%c0_7, %c0_8] : memref<32x128xbf16, #tpu.memory_space<vmem>>, vector<32x128xbf16>
    %cst_9 = arith.constant dense<0.000000e+00> : vector<8x128xf32>
    %14 = tpu.matmul %12, %13, %cst_9 {dimension_numbers = #tpu.dot_dimension_numbers<[1], [0], [0], [1], [0, 0, 1, 1], [], []>} : vector<8x32xbf16>, vector<32x128xbf16>, vector<8x128xf32> -> vector<8x128xf32>
    %c0_10 = arith.constant 0 : index
    %c0_11 = arith.constant 0 : index
    %15 = vector.load %arg5[%c0_10, %c0_11] : memref<1x128xf32, #tpu.memory_space<vmem>>, vector<1x128xf32>
    %16 = vector.broadcast %15 : vector<1x128xf32> to vector<8x128xf32>
    %17 = arith.addf %14, %16 : vector<8x128xf32>
    %c0_12 = arith.constant 0 : index
    %c0_13 = arith.constant 0 : index
    %18 = vector.load %arg6[%c0_12, %c0_13] : memref<8x128xf32, #tpu.memory_space<vmem>>, vector<8x128xf32>
    tpu.vector_store %arg6[%c0_12, %c0_13], %17 {strides = array<i32>} : memref<8x128xf32, #tpu.memory_space<vmem>>, vector<8x128xf32>,
    return
  }
  func.func @transform_0(%arg0: i32) -> (i32, i32) {
    %c0_i32 = arith.constant 0 : i32
    %c0_i32_0 = arith.constant 0 : i32
    return %arg0, %c0_i32 : i32, i32
  }
  func.func @transform_1(%arg0: i32) -> (i32, i32) {
    %c0_i32 = arith.constant 0 : i32
    %c0_i32_0 = arith.constant 0 : i32
    %c0_i32_1 = arith.constant 0 : i32
    return %c0_i32, %c0_i32_0 : i32, i32
  }
  func.func @transform_2(%arg0: i32) -> (i32, i32) {
    %c0_i32 = arith.constant 0 : i32
    %c0_i32_0 = arith.constant 0 : i32
    %c0_i32_1 = arith.constant 0 : i32
    return %c0_i32, %c0_i32_0 : i32, i32
  }
  func.func @transform_3(%arg0: i32) -> (i32, i32) {
    %c0_i32 = arith.constant 0 : i32
    %c0_i32_0 = arith.constant 0 : i32
    %c0_i32_1 = arith.constant 0 : i32
    return %c0_i32, %c0_i32_0 : i32, i32
  }
  func.func @transform_4(%arg0: i32) -> (i32, i32) {
    %c0_i32 = arith.constant 0 : i32
    %c0_i32_0 = arith.constant 0 : i32
    %c0_i32_1 = arith.constant 0 : i32
    return %c0_i32, %c0_i32_0 : i32, i32
  }
  func.func @transform_5(%arg0: i32) -> (i32, i32) {
    %c0_i32 = arith.constant 0 : i32
    %c0_i32_0 = arith.constant 0 : i32
    return %arg0, %c0_i32 : i32, i32
  }
}

</mosaic_0001>

<bundles_post_ra>
// kernel: neural_net_forward.1
= control target key start
LH: loop header
LB: loop body
LE: loop exit
PB: predicated region body
PF: predicated region fallthrough
CT: control target
= control target key end

     0   :  { %s214_s0 = inlined_call_operand.vmem [shape: bf16[8,16], index: 0, kind: input, shape index: {}]   ;;  %s215_s1 = inlined_call_operand.vmem [shape: bf16[16,32], index: 1, kind: input, shape index: {}]   ;;  %s216_s2 = inlined_call_operand.vmem [shape: f32[1,32], index: 2, kind: input, shape index: {}]   ;;  %s217_s3 = inlined_call_operand.vmem [shape: bf16[32,128], index: 3, kind: input, shape index: {}]   ;;  %s218_s4 = inlined_call_operand.vmem [shape: f32[1,128], index: 4, kind: input, shape index: {}]   ;;  %s219_s5 = inlined_call_operand.hbm [shape: f32[8,128], index: 5, kind: output, shape index: {}]  }
   0x1   :  { %v126_v0 = vld [vmem:[%s215_s1] sm:$0xff] }
   0x2   :  { %10 = vsyncpa [#allocation3], 0  ;;  %46 = vmatpush.bf16.msra.mxu0 %v126_v0  ;;  %v22_v1 = vld [vmem:[%s214_s0] sm:$0xf]  ;;  %vm35_vm0 = vcmask 130048   ;;  %v128_v2 = vld [vmem:[%s217_s3 + $0x8] sm:$0xff] }
   0x3   :  { %88 = vmatpush.bf16.msra.mxu1 %v128_v2  ;;  %v127_v3 = vld [vmem:[%s217_s3] sm:$0xff]  ;;  %vm78_vm1 = vcmask 261120   ;;  %s162_s27 = smov [#allocation2]   ;;  %s103_s30 = sshll.u32 %s219_s5, 4  ;;  %s104_s30 = int_to_ptr.hbm [resolvable:$true] %s103_s30 }
   0x4   :  { %v130_v4 = vld [vmem:[%s216_s2] ss:$0 sm:$0xff]  ;;  %s101_s28 = sshll.u32 %s162_s27, 4  ;;  %s102_s28 = int_to_ptr.vmem [resolvable:$true] %s101_s28 }
   0x5   :  { %116 = vmatmul.msk.bf16.vlgmr.msra.gmra.mxu0 %vm35_vm0, %v22_v1  ;;  %v131_v14 = vld [vmem:[%s218_s4] ss:$0 sm:$0xff] }
   0x7   :  { %89 = vmatpush.bf16.msra.mxu1 %v127_v3 }
  0x82   :  { %v48_v5 = vpop.f32.mrf.mxu0 }
  0x83   :  { %v49_v6 = vadd.f32 %v130_v4, %v48_v5 }
  0x85   :  { %v52_v7 = vsub.f32 0.0, %v49_v6 }
  0x87   :  { %v53_v8 = vmul.f32 1.442695, %v52_v7 }
  0x89   :  { %132 = vpow2.f32 %v53_v8 }
  0x8a   :  { %v50_v9 = vpop.f32.mrf.mxu0 }
  0x8f   :  { %v133_v10 = vpop.eup %132 }
  0x90   :  { %v55_v11 = vadd.f32 1.0, %v133_v10 }
  0x92   :  { %134 = vrcp.f32 %v55_v11 }
  0x98   :  { %v135_v12 = vpop.eup %134 }
  0x99   :  { %v57_v13 = vpack.c.bf16 %v135_v12, %v135_v12 }
  0x9b   :  { %125 = vmatmul.msk.bf16.vlgmr.msra.gmra.mxu1 %vm78_vm1, %v57_v13 }
 0x118   :  { %v91_v15 = vpop.f32.mrf.mxu1 }
 0x119   :  { %v92_v16 = vadd.f32 %v131_v14, %v91_v15 }
 0x11b   :  { %95 = vst [vmem:[#allocation2] sm:$0xff] %v92_v16 }
 0x11c   :  { %106 = dma.vmem_to_hbm [thread:$0]  %s102_s28, 128, %s104_s30, [#allocation3]  }
 0x120   :  { %v93_v17 = vpop.f32.mrf.mxu1 }
 0x121   :  { %160 = dma.done.wait [#allocation3], 128  }
 0x122   :  { %161 = vsyncadd [#allocation3], 4294967168 }
 0x123   :  { %111 = vsyncpa [#allocation3], 1 }

</bundles_post_ra>
